<compile_context>
chip_gen: v6e
topology: v6e:2x2x1
jax: 0.10.0
libtpu: 0.0.40
codegen_flags: <defaults>
</compile_context>

<pallas_src>
import jax
import jax.numpy as jnp
from jax import lax
from jax.experimental import pallas as pl
from jax.experimental.pallas import tpu as pltpu

BN_EPS = 1e-5
_VMEM_LIMIT = 32 * 1024 * 1024          # safe on v5e/v6e (128 MiB) and v7x (64 MiB)
_SINGLE_PASS_MAX_PIXELS = 16 * 1024     # N*H*W threshold for the VMEM-resident path


# --------------------------------------------------------------------------
# helpers
# --------------------------------------------------------------------------
def _spatial_tile(p):
    """Largest lane-dense tile (multiple of 128) that evenly divides H*W."""
    for cand in (32768, 16384, 8192, 4096, 2048, 1024, 512, 256, 128):
        if p % cand == 0:
            return cand
    return p  # fallback: full extent (allowed: equals the array dim)


def _batch_block(n, tp):
    """Block a few batch images per grid step to amortize per-step overhead."""
    for bn in (8, 4, 2, 1):
        if n % bn == 0 and bn * tp <= 32768:
            return bn
    return 1


def _spec(shape, index_map, depth=None):
    """BlockSpec, optionally with deeper pipelining if this JAX supports it."""
    if depth is not None:
        try:
            return pl.BlockSpec(shape, index_map, pipeline_mode=pl.Buffered(depth))
        except Exception:  # pragma: no cover - older JAX without pipeline_mode
            pass
    return pl.BlockSpec(shape, index_map)


# --------------------------------------------------------------------------
# single-pass (fully VMEM-resident) kernel for small activations
# --------------------------------------------------------------------------
def _single_pass_kernel(x_ref, wft_ref, gamma_ref, beta_ref, o_ref):
    """conv (fused 1x1x1x1) -> exact batch stats -> BN -> ReLU, all in VMEM."""
    n, c_in, p = x_ref.shape
    x = x_ref[...]                      # (N, Cin, P)
    w = wft_ref[...]                    # (Cout, Cin)

    # Cin is tiny (3): accumulate the 1x1 conv as Cin broadcast FMAs on the VPU
    # (avoids an MXU matmul with K=3 and any layout transposes).
    h = jnp.zeros((n, w.shape[0], p), jnp.float32)
    for c in range(c_in):
        h = h + w[:, c:c + 1] * x[:, c:c + 1, :]        # (Cout,1)*(N,1,P)->(N,Cout,P)

    m = jnp.float32(n * p)
    mean = jnp.sum(jnp.sum(h, axis=2, keepdims=True), axis=0, keepdims=True) / m
    hc = h - mean
    var = jnp.sum(jnp.sum(hc * hc, axis=2, keepdims=True), axis=0, keepdims=True) / m
    inv_std = lax.rsqrt(var + BN_EPS)
    y = gamma_ref[...] * hc * inv_std + beta_ref[...]
    o_ref[...] = jnp.maximum(y, 0.0).astype(o_ref.dtype)


def _single_pass(x3, wft, g2, be2):
    n, c_in, p = x3.shape
    c2 = wft.shape[0]
    ce = pl.CostEstimate(
        flops=int((2 * c2 * c_in + 8 * c2) * n * p),
        transcendentals=int(c2),
        bytes_accessed=int(4 * n * (c_in + c2) * p),
    )
    return pl.pallas_call(
        _single_pass_kernel,
        out_shape=jax.ShapeDtypeStruct((n, c2, p), jnp.float32),
        compiler_params=pltpu.CompilerParams(vmem_limit_bytes=_VMEM_LIMIT),
        cost_estimate=ce,
    )(x3, wft, g2, be2)


# --------------------------------------------------------------------------
# two-pass tiled path for large activations
# --------------------------------------------------------------------------
def _stats_kernel(x_ref, sumx_ref, gram_ref):
    """Pass 1 (moment form): per-input-channel sum and Gram matrix of x."""
    @pl.when(pl.program_id(1) == 0)
    def _():
        sumx_ref[...] = jnp.zeros_like(sumx_ref)
        gram_ref[...] = jnp.zeros_like(gram_ref)

    bn, c_in, _ = x_ref.shape
    s = jnp.zeros((c_in, 1), jnp.float32)
    g = jnp.zeros((c_in, c_in), jnp.float32)
    for b in range(bn):                                   # bn <= 8 (static unroll)
        xb = x_ref[b]                                     # (Cin, TP)
        s = s + jnp.sum(xb, axis=1, keepdims=True)
        # Gram: (Cin, TP) x (Cin, TP)^T contraction over the spatial tile (MXU).
        g = g + lax.dot_general(xb, xb, (((1,), (1,)), ((), ())),
                                preferred_element_type=jnp.float32)
    sumx_ref[...] += s.reshape(sumx_ref.shape)
    gram_ref[...] += g.reshape(gram_ref.shape)


def _norm_kernel(x_ref, wfts_ref, shift_ref, o_ref):
    """Pass 2: fused conv (BN scale folded into weight) + shift + ReLU."""
    w = wfts_ref[...]                                     # (Cout, Cin)
    sh = shift_ref[...]                                   # (Cout, 1)
    bn = x_ref.shape[0]
    for b in range(bn):                                   # bn <= 8 (static unroll)
        hb = jnp.dot(w, x_ref[b], preferred_element_type=jnp.float32)  # (Cout, TP)
        o_ref[b] = jnp.maximum(hb + sh, 0.0).astype(o_ref.dtype)


def _two_pass(x3, wft, g2, be2):
    n, c_in, p = x3.shape
    c2 = wft.shape[0]
    tp = _spatial_tile(p)
    bn = _batch_block(n, tp)
    n_tiles = p // tp
    n_blocks = n // bn

    # ---------------- pass 1: global per-channel input moments ----------------
    ce1 = pl.CostEstimate(
        flops=int((2 * c_in * c_in + c_in) * n * p),
        transcendentals=0,
        bytes_accessed=int(4 * n * c_in * p),
    )
    sumx_parts, gram_parts = pl.pallas_call(
        _stats_kernel,
        out_shape=(jax.ShapeDtypeStruct((n_blocks, c_in, 1), jnp.float32),
                   jax.ShapeDtypeStruct((n_blocks, c_in, c_in), jnp.float32)),
        grid_spec=pltpu.PrefetchScalarGridSpec(
            num_scalar_prefetch=0,
            grid=(n_blocks, n_tiles),
            in_specs=[_spec((bn, c_in, tp), lambda i, t: (i, 0, t), depth=3)],
            out_specs=(
                # per-batch-block partial accumulators -> axis 0 can be 'parallel'
                pl.BlockSpec((1, c_in, 1), lambda i, t: (i, 0, 0)),
                pl.BlockSpec((1, c_in, c_in), lambda i, t: (i, 0, 0)),
            ),
        ),
        compiler_params=pltpu.CompilerParams(
            dimension_semantics=("parallel", "arbitrary"),
            vmem_limit_bytes=_VMEM_LIMIT),
        cost_estimate=ce1,
    )(x3)

    sum_x = jnp.sum(sumx_parts, axis=0)                   # (Cin, 1)
    gram = jnp.sum(gram_parts, axis=0)                    # (Cin, Cin)
    m = jnp.float32(n * p)
    sum_c = wft @ sum_x                                   # (Cout, 1)
    mean = sum_c / m
    ssq_c = jnp.sum((wft @ gram) * wft, axis=1, keepdims=True)   # (Cout, 1)
    # NOTE: E[h^2]-E[h]^2 form; acceptable here, but prone to cancellation for
    # very large activations with |mean| >> std (documented tolerance caveat).
    var = jnp.maximum(ssq_c / m - mean * mean, 0.0)
    inv_std = lax.rsqrt(var + BN_EPS)
    scale = g2 * inv_std                                  # (Cout, 1)
    shift = be2 - scale * mean                            # (Cout, 1)
    wft_scaled = wft * scale                              # fold BN scale into weight

    # ---------------- pass 2: conv + normalize + ReLU ----------------
    ce2 = pl.CostEstimate(
        flops=int((2 * c2 * c_in + 2 * c2) * n * p),
        transcendentals=0,
        bytes_accessed=int(4 * n * (c_in + c2) * p),
    )
    out3 = pl.pallas_call(
        _norm_kernel,
        out_shape=jax.ShapeDtypeStruct((n, c2, p), jnp.float32),
        grid_spec=pltpu.PrefetchScalarGridSpec(
            num_scalar_prefetch=0,
            grid=(n_blocks, n_tiles),
            in_specs=[
                pl.BlockSpec((bn, c_in, tp), lambda i, t: (i, 0, t)),
                pl.BlockSpec((c2, c_in), lambda i, t: (0, 0)),    # loaded once
                pl.BlockSpec((c2, 1), lambda i, t: (0, 0)),       # loaded once
            ],
            out_specs=pl.BlockSpec((bn, c2, tp), lambda i, t: (i, 0, t)),
        ),
        compiler_params=pltpu.CompilerParams(
            dimension_semantics=("parallel", "parallel"),         # megacore on v7x
            vmem_limit_bytes=_VMEM_LIMIT),
        cost_estimate=ce2,
    )(x3, wft_scaled, shift)
    return out3


# --------------------------------------------------------------------------
# public forward
# --------------------------------------------------------------------------
def module_a_forward(x_nchw, params, *, force_two_pass=False):
    """x_nchw: (N, 3, H, W) float32. Returns (N, 16, H, W) float32."""
    n, c_in, h, w = x_nchw.shape
    w1, b1, w2, b2, gamma, beta = params
    c2 = w2.shape[1]
    p = h * w

    # --- trace-time algebraic fusion (exact: no nonlinearity between convs) ---
    wft = (w1 @ w2).T.astype(jnp.float32)                 # (Cout, Cin)
    # Conv biases cancel exactly under training-mode BN's mean subtraction.
    del b1, b2
    # TODO(synk): PyTorch BatchNorm2d (training mode) also updates running_mean /
    # running_var buffers; that stateful side effect is not reproduced here, and
    # eval-mode BN (running statistics) is intentionally not implemented.

    x3 = x_nchw.reshape(n, c_in, p)                       # NCHW-native, pure reshape
    g2 = gamma.reshape(c2, 1).astype(jnp.float32)
    be2 = beta.reshape(c2, 1).astype(jnp.float32)

    if (n * p <= _SINGLE_PASS_MAX_PIXELS) and not force_two_pass:
        out3 = _single_pass(x3, wft, g2, be2)
    else:
        out3 = _two_pass(x3, wft, g2, be2)
    return out3.reshape(n, c2, h, w)


# --------------------------------------------------------------------------
# params + pure-JAX reference
# --------------------------------------------------------------------------
def init_params(key):
    # conv1: Conv2d(in=3, out=16, k=1)  -> weight as (Cin, Cout), bias (16,)
    # conv2: Conv2d(in=16, out=16, k=1) -> weight as (Cin, Cout), bias (16,)
    # bn1:   BatchNorm2d(16)            -> gamma (16,), beta (16,)
    k1, k2, k3, k4, k5, k6 = jax.random.split(key, 6)
    w1 = jax.random.normal(k1, (3, 16), jnp.float32) * 0.1
    b1 = jax.random.normal(k2, (16,), jnp.float32) * 0.1
    w2 = jax.random.normal(k3, (16, 16), jnp.float32) * 0.1
    b2 = jax.random.normal(k4, (16,), jnp.float32) * 0.1
    gamma = 1.0 + 0.1 * jax.random.normal(k5, (16,), jnp.float32)
    beta = 0.1 * jax.random.normal(k6, (16,), jnp.float32)
    return (w1, b1, w2, b2, gamma, beta)


def reference_forward(x_nchw, params):
    """Pure-JAX reference of the original module (with biases, two-pass BN)."""
    w1, b1, w2, b2, gamma, beta = params
    n, c_in, h, w = x_nchw.shape
    xf = jnp.transpose(x_nchw, (0, 2, 3, 1)).reshape(-1, c_in)
    h1 = xf @ w1 + b1
    h2 = h1 @ w2 + b2
    mean = h2.mean(axis=0)
    var = jnp.mean((h2 - mean) ** 2, axis=0)              # biased (training-mode forward)
    y = gamma * (h2 - mean) * lax.rsqrt(var + BN_EPS) + beta
    y = jnp.maximum(y, 0.0)
    return jnp.transpose(y.reshape(n, h, w, -1), (0, 3, 1, 2))


if __name__ == "__main__":
    key = jax.random.PRNGKey(0)
    kx, kp = jax.random.split(key)
    # small shapes consistent with the module: batch=2, in_channels=3, spatial=16
    x = jax.random.normal(kx, (2, 3, 16, 16), jnp.float32)
    params = init_params(kp)

    ref = jax.block_until_ready(reference_forward(x, params))

    # fast path: single-pass, fully VMEM-resident kernel
    out = jax.block_until_ready(module_a_forward(x, params))
    assert out.shape == (2, 16, 16, 16)
    assert bool(jnp.all(out >= 0.0))  # ReLU output is non-negative
    assert bool(jnp.allclose(out, ref, atol=1e-4, rtol=1e-4)), \
        f"single-pass max abs err {float(jnp.max(jnp.abs(out - ref)))}"

    # large-activation path: two-pass tiled kernels (forced, exercised on TPU too)
    out2 = jax.block_until_ready(module_a_forward(x, params, force_two_pass=True))
    assert bool(jnp.allclose(out2, ref, atol=1e-4, rtol=1e-4)), \
        f"two-pass max abs err {float(jnp.max(jnp.abs(out2 - ref)))}"

    print("KERNEL_OK")
</pallas_src>

<mosaic_0001>
module attributes {stable_mosaic.version = 11 : i64} {
  func.func @_single_pass_kernel(%arg0: memref<2x3x256xf32, #tpu.memory_space<vmem>>, %arg1: memref<16x3xf32, #tpu.memory_space<vmem>>, %arg2: memref<16x1xf32, #tpu.memory_space<vmem>>, %arg3: memref<16x1xf32, #tpu.memory_space<vmem>>, %arg4: memref<2x16x256xf32, #tpu.memory_space<vmem>>) attributes {dimension_semantics = [], scalar_prefetch = 0 : i64, scratch_operands = 0 : i64, tpu.core_type = #tpu.core_type<tc>} {
    %c0 = arith.constant 0 : index
    %c0_0 = arith.constant 0 : index
    %c0_1 = arith.constant 0 : index
    %0 = vector.load %arg0[%c0, %c0_0, %c0_1] : memref<2x3x256xf32, #tpu.memory_space<vmem>>, vector<2x3x256xf32>
    %c0_2 = arith.constant 0 : index
    %c0_3 = arith.constant 0 : index
    %1 = vector.load %arg1[%c0_2, %c0_3] : memref<16x3xf32, #tpu.memory_space<vmem>>, vector<16x3xf32>
    %cst = arith.constant 0.000000e+00 : f32
    %2 = vector.broadcast %cst : f32 to vector<2x16x256xf32>
    %3 = vector.extract_strided_slice %1 {offsets = [0, 0], sizes = [16, 1], strides = [1, 1]} : vector<16x3xf32> to vector<16x1xf32>
    %4 = vector.extract_strided_slice %0 {offsets = [0, 0, 0], sizes = [2, 1, 256], strides = [1, 1, 1]} : vector<2x3x256xf32> to vector<2x1x256xf32>
    %5 = vector.shape_cast %3 : vector<16x1xf32> to vector<1x16x1xf32>
    %6 = vector.broadcast %5 : vector<1x16x1xf32> to vector<2x16x256xf32>
    %7 = vector.broadcast %4 : vector<2x1x256xf32> to vector<2x16x256xf32>
    %8 = arith.mulf %6, %7 : vector<2x16x256xf32>
    %9 = arith.addf %2, %8 : vector<2x16x256xf32>
    %10 = vector.extract_strided_slice %1 {offsets = [0, 1], sizes = [16, 1], strides = [1, 1]} : vector<16x3xf32> to vector<16x1xf32>
    %11 = vector.extract_strided_slice %0 {offsets = [0, 1, 0], sizes = [2, 1, 256], strides = [1, 1, 1]} : vector<2x3x256xf32> to vector<2x1x256xf32>
    %12 = vector.shape_cast %10 : vector<16x1xf32> to vector<1x16x1xf32>
    %13 = vector.broadcast %12 : vector<1x16x1xf32> to vector<2x16x256xf32>
    %14 = vector.broadcast %11 : vector<2x1x256xf32> to vector<2x16x256xf32>
    %15 = arith.mulf %13, %14 : vector<2x16x256xf32>
    %16 = arith.addf %9, %15 : vector<2x16x256xf32>
    %17 = vector.extract_strided_slice %1 {offsets = [0, 2], sizes = [16, 1], strides = [1, 1]} : vector<16x3xf32> to vector<16x1xf32>
    %18 = vector.extract_strided_slice %0 {offsets = [0, 2, 0], sizes = [2, 1, 256], strides = [1, 1, 1]} : vector<2x3x256xf32> to vector<2x1x256xf32>
    %19 = vector.shape_cast %17 : vector<16x1xf32> to vector<1x16x1xf32>
    %20 = vector.broadcast %19 : vector<1x16x1xf32> to vector<2x16x256xf32>
    %21 = vector.broadcast %18 : vector<2x1x256xf32> to vector<2x16x256xf32>
    %22 = arith.mulf %20, %21 : vector<2x16x256xf32>
    %23 = arith.addf %16, %22 : vector<2x16x256xf32>
    %cst_4 = arith.constant dense<0.000000e+00> : vector<2x16xf32>
    %24 = vector.multi_reduction <add>, %23, %cst_4 [2] : vector<2x16x256xf32> to vector<2x16xf32>
    %25 = vector.shape_cast %24 : vector<2x16xf32> to vector<2x16x1xf32>
    %cst_5 = arith.constant dense<0.000000e+00> : vector<16x1xf32>
    %26 = vector.multi_reduction <add>, %25, %cst_5 [0] : vector<2x16x1xf32> to vector<16x1xf32>
    %27 = vector.shape_cast %26 : vector<16x1xf32> to vector<1x16x1xf32>
    %cst_6 = arith.constant 5.120000e+02 : f32
    %28 = vector.broadcast %cst_6 : f32 to vector<1x16x1xf32>
    %29 = arith.divf %27, %28 : vector<1x16x1xf32>
    %30 = vector.broadcast %29 : vector<1x16x1xf32> to vector<2x16x256xf32>
    %31 = arith.subf %23, %30 : vector<2x16x256xf32>
    %32 = arith.mulf %31, %31 : vector<2x16x256xf32>
    %cst_7 = arith.constant dense<0.000000e+00> : vector<2x16xf32>
    %33 = vector.multi_reduction <add>, %32, %cst_7 [2] : vector<2x16x256xf32> to vector<2x16xf32>
    %34 = vector.shape_cast %33 : vector<2x16xf32> to vector<2x16x1xf32>
    %cst_8 = arith.constant dense<0.000000e+00> : vector<16x1xf32>
    %35 = vector.multi_reduction <add>, %34, %cst_8 [0] : vector<2x16x1xf32> to vector<16x1xf32>
    %36 = vector.shape_cast %35 : vector<16x1xf32> to vector<1x16x1xf32>
    %cst_9 = arith.constant 5.120000e+02 : f32
    %37 = vector.broadcast %cst_9 : f32 to vector<1x16x1xf32>
    %38 = arith.divf %36, %37 : vector<1x16x1xf32>
    %cst_10 = arith.constant 9.99999974E-6 : f32
    %39 = vector.broadcast %cst_10 : f32 to vector<1x16x1xf32>
    %40 = arith.addf %38, %39 : vector<1x16x1xf32>
    %41 = math.rsqrt %40 : vector<1x16x1xf32>
    %c0_11 = arith.constant 0 : index
    %c0_12 = arith.constant 0 : index
    %42 = vector.load %arg2[%c0_11, %c0_12] : memref<16x1xf32, #tpu.memory_space<vmem>>, vector<16x1xf32>
    %43 = vector.shape_cast %42 : vector<16x1xf32> to vector<1x16x1xf32>
    %44 = vector.broadcast %43 : vector<1x16x1xf32> to vector<2x16x256xf32>
    %45 = arith.mulf %44, %31 : vector<2x16x256xf32>
    %46 = vector.broadcast %41 : vector<1x16x1xf32> to vector<2x16x256xf32>
    %47 = arith.mulf %45, %46 : vector<2x16x256xf32>
    %c0_13 = arith.constant 0 : index
    %c0_14 = arith.constant 0 : index
    %48 = vector.load %arg3[%c0_13, %c0_14] : memref<16x1xf32, #tpu.memory_space<vmem>>, vector<16x1xf32>
    %49 = vector.shape_cast %48 : vector<16x1xf32> to vector<1x16x1xf32>
    %50 = vector.broadcast %49 : vector<1x16x1xf32> to vector<2x16x256xf32>
    %51 = arith.addf %47, %50 : vector<2x16x256xf32>
    %cst_15 = arith.constant 0.000000e+00 : f32
    %52 = vector.broadcast %cst_15 : f32 to vector<2x16x256xf32>
    %53 = arith.maximumf %51, %52 : vector<2x16x256xf32>
    %c0_16 = arith.constant 0 : index
    %c0_17 = arith.constant 0 : index
    %c0_18 = arith.constant 0 : index
    %54 = vector.load %arg4[%c0_16, %c0_17, %c0_18] : memref<2x16x256xf32, #tpu.memory_space<vmem>>, vector<2x16x256xf32>
    tpu.vector_store %arg4[%c0_16, %c0_17, %c0_18], %53 {strides = array<i32>} : memref<2x16x256xf32, #tpu.memory_space<vmem>>, vector<2x16x256xf32>,
    return
  }
}

</mosaic_0001>

<bundles_post_ra>
// kernel: tpu_custom_call.1
= control target key start
LH: loop header
LB: loop body
LE: loop exit
PB: predicated region body
PF: predicated region fallthrough
CT: control target
= control target key end

     0   :  { %v377_v1 = vmov 1   ;;  %v378_v2 = vmov 0   ;;  %s445_s0 = inlined_call_operand.vmem [shape: f32[2,3,256], index: 0, kind: input, shape index: {}]   ;;  %s446_s1 = inlined_call_operand.vmem [shape: f32[16,3], index: 1, kind: input, shape index: {}]   ;;  %s447_s2 = inlined_call_operand.vmem [shape: f32[16,1], index: 2, kind: input, shape index: {}]   ;;  %s448_s3 = inlined_call_operand.vmem [shape: f32[16,1], index: 3, kind: input, shape index: {}]   ;;  %s449_s4 = inlined_call_operand.hbm [shape: f32[2,16,256], index: 4, kind: output, shape index: {}]  }
   0x1   :  { %v20_v0 = vld [vmem:[%s446_s1] sm:$0xff]  ;;  %346 = vset.pattern.permute.xlu1 %v377_v1  ;;  %345 = vset.pattern.permute.xlu0 %v378_v2 }
   0x2   :  { %9 = vsyncpa [#allocation3], 0  ;;  %87 = vperm.xlu1 %346, %v20_v0   ;;  %24 = vperm.xlu0 %345, %v20_v0   ;;  %v21_v3 = vld [vmem:[%s446_s1 + $0x8] sm:$0xff]  ;;  %v379_v4 = vmov 2   ;;  %v34_v5 = vlaneseq  ;;  %v18_v9 = vld [vmem:[%s445_s0] sm:$0x77] }
   0x3   :  { %v19_v10 = vld [vmem:[%s445_s0 + $0x8] sm:$0x77] }
   0x4   :  { %v35_v6 = vshrl.u32 %v34_v5, 7 }
   0x6   :  { %91 = vperm.xlu1 %346, %v21_v3   ;;  %29 = vperm.xlu0 %345, %v21_v3   ;;  %v96_v7 = vsub.s32 1, %v35_v6  ;;  %v100_v8 = vsub.s32 5, %v35_v6  ;;  %v36_v11 = vsub.s32 0, %v35_v6  ;;  %v40_v12 = vsub.s32 4, %v35_v6 }
   0x7   :  { %v156_v13 = vsub.s32 2, %v35_v6  ;;  %v160_v14 = vsub.s32 6, %v35_v6 }
   0x8   :  { %v97_v15 = vrot.slane %v18_v9, %v96_v7  ;;  %v101_v16 = vrot.slane %v18_v9, %v100_v8  ;;  %v105_v17 = vrot.slane %v19_v10, %v96_v7  ;;  %v109_v18 = vrot.slane %v19_v10, %v100_v8 }
   0x9   :  { %v37_v19 = vrot.slane %v18_v9, %v36_v11  ;;  %v41_v20 = vrot.slane %v18_v9, %v40_v12  ;;  %v45_v21 = vrot.slane %v19_v10, %v36_v11  ;;  %v49_v22 = vrot.slane %v19_v10, %v40_v12 }
   0xa   :  { %348 = vset.pattern.permute.xlu1 %v379_v4  ;;  %347 = vset.pattern.permute.xlu0 %v379_v4  ;;  %v157_v23 = vrot.slane %v18_v9, %v156_v13  ;;  %v161_v24 = vrot.slane %v18_v9, %v160_v14  ;;  %v117_v25 = vrot.slane %v97_v15, %v96_v7 }
   0xb   :  { %151 = vperm.xlu1 %348, %v21_v3   ;;  %147 = vperm.xlu0 %347, %v20_v0   ;;  %v121_v26 = vrot.slane %v101_v16, %v96_v7  ;;  %v125_v27 = vrot.slane %v105_v17, %v96_v7  ;;  %v129_v28 = vrot.slane %v109_v18, %v96_v7 }
   0xc   :  { %v57_v31 = vrot.slane %v37_v19, %v36_v11  ;;  %v61_v32 = vrot.slane %v41_v20, %v36_v11  ;;  %v65_v33 = vrot.slane %v45_v21, %v36_v11  ;;  %v69_v34 = vrot.slane %v49_v22, %v36_v11 }
   0xd   :  { %v177_v35 = vrot.slane %v157_v23, %v156_v13  ;;  %v181_v36 = vrot.slane %v161_v24, %v156_v13  ;;  %v165_v37 = vrot.slane %v19_v10, %v156_v13  ;;  %v169_v38 = vrot.slane %v19_v10, %v160_v14 }
   0xf   :  { %350 = vset.pattern.permute.xlu1 %v378_v2  ;;  %349 = vset.pattern.permute.xlu0 %v378_v2  ;;  %v185_v57 = vrot.slane %v165_v37, %v156_v13  ;;  %v189_v58 = vrot.slane %v169_v38, %v156_v13 }
  0x7d   :  { %v88_v29 = vpop.permute.xlu1 %87  ;;  %v25_v30 = vpop.permute.xlu0 %24 }
  0x7e   :  { %v130_v39 = vmul.f32 %v117_v25, %v88_v29  ;;  %v131_v40 = vmul.f32 %v121_v26, %v88_v29  ;;  %v134_v41 = vmul.f32 %v125_v27, %v88_v29  ;;  %v135_v42 = vmul.f32 %v129_v28, %v88_v29 }
  0x7f   :  { %v70_v43 = vmul.f32 %v57_v31, %v25_v30  ;;  %v71_v44 = vmul.f32 %v61_v32, %v25_v30  ;;  %v74_v45 = vmul.f32 %v65_v33, %v25_v30  ;;  %v75_v46 = vmul.f32 %v69_v34, %v25_v30 }
  0x81   :  { %v92_v47 = vpop.permute.xlu1 %91  ;;  %v30_v48 = vpop.permute.xlu0 %29  ;;  %v138_v59 = vadd.f32 %v130_v39, %v70_v43  ;;  %v139_v60 = vadd.f32 %v131_v40, %v71_v44  ;;  %v142_v61 = vadd.f32 %v134_v41, %v74_v45  ;;  %v143_v62 = vadd.f32 %v135_v42, %v75_v46 }
  0x82   :  { %v132_v49 = vmul.f32 %v117_v25, %v92_v47  ;;  %v133_v50 = vmul.f32 %v121_v26, %v92_v47  ;;  %v136_v51 = vmul.f32 %v125_v27, %v92_v47  ;;  %v137_v52 = vmul.f32 %v129_v28, %v92_v47 }
  0x83   :  { %v72_v53 = vmul.f32 %v57_v31, %v30_v48  ;;  %v73_v54 = vmul.f32 %v61_v32, %v30_v48  ;;  %v76_v55 = vmul.f32 %v65_v33, %v30_v48  ;;  %v77_v56 = vmul.f32 %v69_v34, %v30_v48  ;;  %v260_v48 = vld [vmem:[%s447_s2 + $0x8] sm:$0xff] }
  0x85   :  { %v140_v1 = vadd.f32 %v132_v49, %v72_v53  ;;  %v141_v2 = vadd.f32 %v133_v50, %v73_v54  ;;  %v144_v3 = vadd.f32 %v136_v51, %v76_v55  ;;  %v145_v4 = vadd.f32 %v137_v52, %v77_v56  ;;  %v287_v49 = vld [vmem:[%s448_s3] sm:$0xff]  ;;  %v288_v56 = vld [vmem:[%s448_s3 + $0x8] sm:$0xff] }
  0x86   :  { %v152_v63 = vpop.permute.xlu1 %151  ;;  %v148_v0 = vpop.permute.xlu0 %147  ;;  %v259_v50 = vld [vmem:[%s447_s2] sm:$0xff]  ;;  %s380_s2 = smov [#allocation2]  }
  0x87   :  { %v192_v5 = vmul.f32 %v177_v35, %v152_v63  ;;  %v193_v6 = vmul.f32 %v181_v36, %v152_v63  ;;  %v190_v7 = vmul.f32 %v177_v35, %v148_v0  ;;  %v191_v8 = vmul.f32 %v181_v36, %v148_v0  ;;  %s328_s3 = sshll.u32 %s380_s2, 4  ;;  %s329_s3 = int_to_ptr.vmem [resolvable:$true] %s328_s3 }
  0x88   :  { %v194_v9 = vmul.f32 %v185_v57, %v148_v0  ;;  %v195_v10 = vmul.f32 %v189_v58, %v148_v0  ;;  %v196_v11 = vmul.f32 %v185_v57, %v152_v63  ;;  %v197_v12 = vmul.f32 %v189_v58, %v152_v63  ;;  %s355_s29 = scalar_lea.vmem %s329_s3, 1024  ;;  %p360_p1 = scmp.lt.s32.totalorder %s329_s3, %s329_s3 }
  0x89   :  { %v200_v14 = vadd.f32 %v192_v5, %v140_v1  ;;  %v201_v13 = vadd.f32 %v193_v6, %v141_v2  ;;  %v198_v15 = vadd.f32 %v190_v7, %v138_v59  ;;  %v199_v16 = vadd.f32 %v191_v8, %v139_v60  ;;  %p356_p0 = scmp.ne.s32.totalorder %s329_s3, %s355_s29  ;;  %p361_p2 = scmp.lt.s32.totalorder %s355_s29, %s355_s29 }
  0x8a   :  { %v202_v17 = vadd.f32 %v194_v9, %v142_v61  ;;  %v203_v18 = vadd.f32 %v195_v10, %v143_v62  ;;  %v204_v21 = vadd.f32 %v196_v11, %v144_v3  ;;  %v205_v22 = vadd.f32 %v197_v12, %v145_v4 }
  0x8b   :  { %v209_v19 = vadd.f32 %v201_v13, %v200_v14  ;;  %v206_v20 = vadd.f32 %v199_v16, %v198_v15  ;;  %p362_p3 = por %p361_p2, %p360_p1 }
  0x8c   :  { %v212_v23 = vadd.f32 %v203_v18, %v202_v17  ;;  %v215_v24 = vadd.f32 %v205_v22, %v204_v21 }
  0x8d   :  { %210 = vadd.xlane.f32.xlu0 %v209_v19  ;;  %207 = vadd.xlane.f32.xlu1 %v206_v20  ;;  %p363_p4 = pnand %p362_p3, %p356_p0 }
  0x91   :  { %213 = vadd.xlane.f32.xlu0 %v212_v23  ;;  %216 = vadd.xlane.f32.xlu1 %v215_v24 }
 0x116   :  { %v211_v25 = vpop.xlane.xlu0 %210  ;;  %v208_v26 = vpop.xlane.xlu1 %207 }
 0x11a   :  { %v214_v27 = vpop.xlane.xlu0 %213  ;;  %v217_v28 = vpop.xlane.xlu1 %216 }
 0x11b   :  { %v218_v29 = vadd.f32 %v214_v27, %v208_v26  ;;  %v219_v30 = vadd.f32 %v217_v28, %v211_v25 }
 0x11d   :  { %v221_v31 = vmul.f32 0.001953125, %v218_v29  ;;  %v222_v32 = vmul.f32 0.001953125, %v219_v30 }
 0x11f   :  { %v223_v33 = vsub.f32 %v198_v15, %v221_v31  ;;  %v224_v34 = vsub.f32 %v199_v16, %v221_v31  ;;  %v420_v35 = vsub.f32 %v200_v14, %v222_v32  ;;  %v422_v36 = vsub.f32 %v201_v13, %v222_v32 }
 0x120   :  { %v227_v37 = vsub.f32 %v202_v17, %v221_v31  ;;  %v228_v38 = vsub.f32 %v203_v18, %v221_v31  ;;  %v229_v51 = vsub.f32 %v204_v21, %v222_v32  ;;  %v230_v52 = vsub.f32 %v205_v22, %v222_v32 }
 0x121   :  { %v231_v39 = vmul.f32 %v223_v33, %v223_v33  ;;  %v232_v40 = vmul.f32 %v224_v34, %v224_v34  ;;  %v233_v41 = vmul.f32 %v420_v35, %v420_v35  ;;  %v234_v42 = vmul.f32 %v422_v36, %v422_v36 }
 0x122   :  { %v235_v45 = vmul.f32 %v227_v37, %v227_v37  ;;  %v236_v46 = vmul.f32 %v228_v38, %v228_v38  ;;  %v237_v53 = vmul.f32 %v229_v51, %v229_v51  ;;  %v238_v54 = vmul.f32 %v230_v52, %v230_v52 }
 0x123   :  { %v239_v43 = vadd.f32 %v232_v40, %v231_v39  ;;  %v242_v44 = vadd.f32 %v234_v42, %v233_v41 }
 0x124   :  { %v245_v47 = vadd.f32 %v236_v46, %v235_v45  ;;  %v248_v55 = vadd.f32 %v238_v54, %v237_v53 }
 0x125   :  { %240 = vadd.xlane.f32.xlu0 %v239_v43  ;;  %243 = vadd.xlane.f32.xlu1 %v242_v44 }
 0x129   :  { %246 = vadd.xlane.f32.xlu0 %v245_v47 }
 0x136   :  { %268 = vperm.xlu1 %350, %v260_v48  }
 0x13a   :  { %291 = vperm.xlu1 %350, %v287_v49  }
 0x13f   :  { %263 = vperm.xlu0 %349, %v259_v50  }
 0x15e   :  { %249 = vadd.xlane.f32.xlu1 %v248_v55 }
 0x16f   :  { %296 = vperm.xlu1 %350, %v288_v56  }
 0x1ae   :  { %v241_v57 = vpop.xlane.xlu0 %240  ;;  %v244_v62 = vpop.xlane.xlu1 %243 }
 0x1b2   :  { %v247_v58 = vpop.xlane.xlu0 %246  ;;  %v269_v63 = vpop.permute.xlu1 %268 }
 0x1b3   :  { %v251_v59 = vadd.f32 %v247_v58, %v241_v57  ;;  %v273_v23 = vmul.f32 %v269_v63, %v420_v35  ;;  %v274_v24 = vmul.f32 %v269_v63, %v422_v36  ;;  %v277_v25 = vmul.f32 %v269_v63, %v229_v51 }
 0x1b4   :  { %v278_v26 = vmul.f32 %v269_v63, %v230_v52 }
 0x1b5   :  { %v253_v60 = vmul.f32 0.001953125, %v251_v59 }
 0x1b6   :  { %v292_v10 = vpop.permute.xlu1 %291 }
 0x1b7   :  { %v255_v61 = vadd.f32 1e-05, %v253_v60 }
 0x1b9   :  { %351 = vrsqrt.f32 %v255_v61 }
 0x1ba   :  { %v264_v0 = vpop.permute.xlu0 %263 }
 0x1bb   :  { %v271_v1 = vmul.f32 %v264_v0, %v223_v33  ;;  %v272_v2 = vmul.f32 %v264_v0, %v224_v34  ;;  %v275_v3 = vmul.f32 %v264_v0, %v227_v37  ;;  %v276_v4 = vmul.f32 %v264_v0, %v228_v38 }
 0x1c6   :  { %v352_v5 = vpop.eup %351 }
 0x1c7   :  { %v279_v6 = vmul.f32 %v352_v5, %v271_v1  ;;  %v280_v7 = vmul.f32 %v352_v5, %v272_v2  ;;  %v283_v8 = vmul.f32 %v352_v5, %v275_v3  ;;  %v284_v9 = vmul.f32 %v352_v5, %v276_v4 }
 0x1c9   :  { %v299_v11 = vadd.f32 %v292_v10, %v279_v6  ;;  %v300_v12 = vadd.f32 %v292_v10, %v280_v7  ;;  %v303_v14 = vadd.f32 %v292_v10, %v283_v8  ;;  %v304_v13 = vadd.f32 %v292_v10, %v284_v9 }
 0x1cb   :  { %v307_v15 = vmax.f32 %v299_v11, 0.0  ;;  %v308_v16 = vmax.f32 %v300_v12, 0.0  ;;  %v311_v17 = vmax.f32 %v303_v14, 0.0  ;;  %v312_v18 = vmax.f32 %v304_v13, 0.0 }
 0x1cd   :  { %315 = vst [vmem:[#allocation2] sm:$0xff] %v307_v15  ;;  %316 = vst [vmem:[#allocation2 + $0x8] sm:$0xff] %v308_v16 }
 0x1ce   :  { %319 = vst [vmem:[#allocation2 + $0x20] sm:$0xff] %v311_v17  ;;  %320 = vst [vmem:[#allocation2 + $0x28] sm:$0xff] %v312_v18 }
 0x1e7   :  { %v250_v19 = vpop.xlane.xlu1 %249 }
 0x1e8   :  { %v252_v20 = vadd.f32 %v250_v19, %v244_v62 }
 0x1ea   :  { %v254_v21 = vmul.f32 0.001953125, %v252_v20 }
 0x1eb   :  { %v297_v32 = vpop.permute.xlu1 %296 }
 0x1ec   :  { %v256_v22 = vadd.f32 1e-05, %v254_v21 }
 0x1ee   :  { %353 = vrsqrt.f32 %v256_v22 }
 0x1fb   :  { %v354_v27 = vpop.eup %353 }
 0x1fc   :  { %v281_v28 = vmul.f32 %v354_v27, %v273_v23  ;;  %v282_v29 = vmul.f32 %v354_v27, %v274_v24  ;;  %v285_v30 = vmul.f32 %v354_v27, %v277_v25  ;;  %v286_v31 = vmul.f32 %v354_v27, %v278_v26 }
 0x1fe   :  { %v301_v33 = vadd.f32 %v297_v32, %v281_v28  ;;  %v302_v34 = vadd.f32 %v297_v32, %v282_v29  ;;  %v305_v37 = vadd.f32 %v297_v32, %v285_v30  ;;  %v306_v38 = vadd.f32 %v297_v32, %v286_v31 }
 0x200   :  { %v309_v39 = vmax.f32 %v301_v33, 0.0  ;;  %v310_v40 = vmax.f32 %v302_v34, 0.0  ;;  %v313_v41 = vmax.f32 %v305_v37, 0.0  ;;  %v314_v35 = vmax.f32 %v306_v38, 0.0 }
 0x202   :  { %317 = vst [vmem:[#allocation2 + $0x10] sm:$0xff] %v309_v39  ;;  %318 = vst [vmem:[#allocation2 + $0x18] sm:$0xff] %v310_v40 }
 0x203   :  { %321 = vst [vmem:[#allocation2 + $0x30] sm:$0xff] %v313_v41  ;;  %322 = vst [vmem:[#allocation2 + $0x38] sm:$0xff] %v314_v35 }
 0x204   :  { %366 = shalt.err (!%p363_p4)
}
 0x205   :  { %s381_s30 = smov 256   ;;  %s382_s5 = smov 16  }
 0x206   :  { %334 = dma.vmem_to_hbm [thread:$0]  %s329_s3, 1024, %s449_s4, [#allocation3], %s381_s30, %s381_s30, %s382_s5  }
 0x207   :  { %375 = dma.done.wait [#allocation3], 1024  }
 0x208   :  { %376 = vsyncadd [#allocation3], 4294966272 }
 0x209   :  { %338 = vsyncpa [#allocation3], 1 }

</bundles_post_ra>
